<compile_context>
chip_gen: v7x
topology: tpu7x:2x2x1
jax: 0.10.0
libtpu: 0.0.40
codegen_flags: <defaults>
</compile_context>

<pallas_src>
import jax
import jax.numpy as jnp
from jax.experimental import pallas as pl
from jax.experimental.pallas import tpu as pltpu

IN_DIM, HID, OUT_DIM = 5, 100, 2500          # logical (PyTorch) dims
IN_PAD, HID_PAD, OUT_PAD = 8, 128, 2560      # padded, (8,128)-aligned dims
TN = 640                                     # fc3 output tile (multiple of 128)


def mlp_kernel(x_ref, w1_ref, b1_ref, w2_ref, b2_ref, w3_ref, b3_ref, o_ref):
    # h1 / h2 are tiny (B x 128); recompute per output tile so each grid step
    # is independent (required for "parallel" semantics on megacore).
    h1 = jnp.dot(x_ref[...], w1_ref[...], preferred_element_type=jnp.float32)
    h1 = jnp.maximum(h1 + b1_ref[...], 0.0)                      # f32 ReLU (v5e-safe)
    h2 = jnp.dot(h1, w2_ref[...], preferred_element_type=jnp.float32)
    h2 = jnp.maximum(h2 + b2_ref[...], 0.0)
    # fc3: bf16 x bf16 on the MXU, f32 accumulation.
    out = jnp.dot(h2.astype(w3_ref.dtype), w3_ref[...],
                  preferred_element_type=jnp.float32)
    o_ref[...] = (out + b3_ref[...]).astype(o_ref.dtype)


def mlp_forward(x_pad, w1, b1, w2, b2, w3, b3):
    """x_pad: [B, IN_PAD] f32; w1/b1/w2/b2 padded f32; w3 [HID_PAD, OUT_PAD] bf16;
    b3 [1, OUT_PAD] f32. Returns [B, OUT_DIM] f32."""
    B = x_pad.shape[0]
    n_tiles = OUT_PAD // TN

    grid_spec = pltpu.PrefetchScalarGridSpec(
        num_scalar_prefetch=0,
        grid=(n_tiles,),
        in_specs=[
            pl.BlockSpec((B, IN_PAD), lambda j: (0, 0)),
            pl.BlockSpec((IN_PAD, HID_PAD), lambda j: (0, 0)),
            pl.BlockSpec((1, HID_PAD), lambda j: (0, 0)),
            pl.BlockSpec((HID_PAD, HID_PAD), lambda j: (0, 0)),
            pl.BlockSpec((1, HID_PAD), lambda j: (0, 0)),
            pl.BlockSpec((HID_PAD, TN), lambda j: (0, j)),   # w3 tiled over N
            pl.BlockSpec((1, TN), lambda j: (0, j)),         # b3 tiled over N
        ],
        out_specs=pl.BlockSpec((B, TN), lambda j: (0, j)),
    )

    out_pad = pl.pallas_call(
        mlp_kernel,
        out_shape=jax.ShapeDtypeStruct((B, OUT_PAD), jnp.float32),
        grid_spec=grid_spec,
        compiler_params=pltpu.CompilerParams(
            dimension_semantics=("parallel",),
            vmem_limit_bytes=4 << 20,
        ),
    )(x_pad, w1, b1, w2, b2, w3, b3)

    return out_pad[:, :OUT_DIM]


def init_linear(key, in_f, out_f):
    """Deterministic init mimicking nn.Linear (uniform(-1/sqrt(in), 1/sqrt(in))).
    Returns PyTorch-layout W (out, in) and bias (out,)."""
    kw, kb = jax.random.split(key)
    bound = 1.0 / jnp.sqrt(jnp.float32(in_f))
    w = jax.random.uniform(kw, (out_f, in_f), jnp.float32, -bound, bound)
    b = jax.random.uniform(kb, (out_f,), jnp.float32, -bound, bound)
    return w, b


def prepare_params(w1, b1, w2, b2, w3, b3):
    """Transpose to [in, out], zero-pad to aligned dims, cast w3 to bf16."""
    w1p = jnp.zeros((IN_PAD, HID_PAD), jnp.float32).at[:IN_DIM, :HID].set(w1.T)
    b1p = jnp.zeros((1, HID_PAD), jnp.float32).at[0, :HID].set(b1)
    w2p = jnp.zeros((HID_PAD, HID_PAD), jnp.float32).at[:HID, :HID].set(w2.T)
    b2p = jnp.zeros((1, HID_PAD), jnp.float32).at[0, :HID].set(b2)
    w3p = jnp.zeros((HID_PAD, OUT_PAD), jnp.float32).at[:HID, :OUT_DIM].set(w3.T)
    b3p = jnp.zeros((1, OUT_PAD), jnp.float32).at[0, :OUT_DIM].set(b3)
    return w1p, b1p, w2p, b2p, w3p.astype(jnp.bfloat16), b3p


def pad_x(x):
    B = x.shape[0]
    return jnp.zeros((B, IN_PAD), jnp.float32).at[:, :IN_DIM].set(x)


def reference_forward(x, w1, b1, w2, b2, w3, b3):
    """Pure f32 reference with the original (unpadded, PyTorch-layout) params."""
    h1 = jnp.maximum(x @ w1.T + b1, 0.0)
    h2 = jnp.maximum(h1 @ w2.T + b2, 0.0)
    return h2 @ w3.T + b3


if __name__ == "__main__":
    key = jax.random.PRNGKey(0)
    k_x, k1, k2, k3 = jax.random.split(key, 4)

    B = 8  # small batch; at B=8 the kernel is DMA-bound (see notes)
    x = jax.random.normal(k_x, (B, IN_DIM), jnp.float32)

    w1, b1 = init_linear(k1, IN_DIM, HID)
    w2, b2 = init_linear(k2, HID, HID)
    w3, b3 = init_linear(k3, HID, OUT_DIM)

    params = prepare_params(w1, b1, w2, b2, w3, b3)
    x_pad = pad_x(x)

    out = mlp_forward(x_pad, *params)
    out = jax.block_until_ready(out)

    ref = reference_forward(x, w1, b1, w2, b2, w3, b3)
    assert out.shape == (B, OUT_DIM), out.shape
    # bf16 w3 -> relaxed tolerance vs the f32 reference.
    max_err = jnp.max(jnp.abs(out - ref))
    assert jnp.allclose(out, ref, atol=2e-2, rtol=2e-2), f"mismatch: {max_err}"

    print("KERNEL_OK")
</pallas_src>

<mosaic_0001>
module attributes {stable_mosaic.version = 11 : i64} {
  func.func @mlp_kernel(%arg0: i32, %arg1: memref<8x8xf32, #tpu.memory_space<vmem>>, %arg2: memref<8x128xf32, #tpu.memory_space<vmem>>, %arg3: memref<1x128xf32, #tpu.memory_space<vmem>>, %arg4: memref<128x128xf32, #tpu.memory_space<vmem>>, %arg5: memref<1x128xf32, #tpu.memory_space<vmem>>, %arg6: memref<128x640xbf16, #tpu.memory_space<vmem>>, %arg7: memref<1x640xf32, #tpu.memory_space<vmem>>, %arg8: memref<8x640xf32, #tpu.memory_space<vmem>>) attributes {dimension_semantics = [#tpu.dimension_semantics<parallel>], iteration_bounds = array<i64: 4>, scalar_prefetch = 0 : i64, scratch_operands = 0 : i64, tpu.core_type = #tpu.core_type<tc>, window_params = [{pipeline_mode = #tpu.pipeline_mode<synchronous>, transform_indices = @transform_0, window_bounds = array<i64: 8, 8>}, {pipeline_mode = #tpu.pipeline_mode<synchronous>, transform_indices = @transform_1, window_bounds = array<i64: 8, 128>}, {pipeline_mode = #tpu.pipeline_mode<synchronous>, transform_indices = @transform_2, window_bounds = array<i64: 1, 128>}, {pipeline_mode = #tpu.pipeline_mode<synchronous>, transform_indices = @transform_3, window_bounds = array<i64: 128, 128>}, {pipeline_mode = #tpu.pipeline_mode<synchronous>, transform_indices = @transform_4, window_bounds = array<i64: 1, 128>}, {transform_indices = @transform_5, window_bounds = array<i64: 128, 640>}, {transform_indices = @transform_6, window_bounds = array<i64: 1, 640>}, {transform_indices = @transform_7, window_bounds = array<i64: 8, 640>}]} {
    %c0 = arith.constant 0 : index
    %c0_0 = arith.constant 0 : index
    %0 = vector.load %arg1[%c0, %c0_0] : memref<8x8xf32, #tpu.memory_space<vmem>>, vector<8x8xf32>
    %c0_1 = arith.constant 0 : index
    %c0_2 = arith.constant 0 : index
    %1 = vector.load %arg2[%c0_1, %c0_2] : memref<8x128xf32, #tpu.memory_space<vmem>>, vector<8x128xf32>
    %cst = arith.constant dense<0.000000e+00> : vector<8x128xf32>
    %2 = tpu.matmul %0, %1, %cst {dimension_numbers = #tpu.dot_dimension_numbers<[1], [0], [0], [1], [0, 0, 1, 1], [], []>} : vector<8x8xf32>, vector<8x128xf32>, vector<8x128xf32> -> vector<8x128xf32>
    %c0_3 = arith.constant 0 : index
    %c0_4 = arith.constant 0 : index
    %3 = vector.load %arg3[%c0_3, %c0_4] : memref<1x128xf32, #tpu.memory_space<vmem>>, vector<1x128xf32>
    %4 = vector.broadcast %3 : vector<1x128xf32> to vector<8x128xf32>
    %5 = arith.addf %2, %4 : vector<8x128xf32>
    %cst_5 = arith.constant 0.000000e+00 : f32
    %6 = vector.broadcast %cst_5 : f32 to vector<8x128xf32>
    %7 = arith.maximumf %5, %6 : vector<8x128xf32>
    %c0_6 = arith.constant 0 : index
    %c0_7 = arith.constant 0 : index
    %8 = vector.load %arg4[%c0_6, %c0_7] : memref<128x128xf32, #tpu.memory_space<vmem>>, vector<128x128xf32>
    %cst_8 = arith.constant dense<0.000000e+00> : vector<8x128xf32>
    %9 = tpu.matmul %7, %8, %cst_8 {dimension_numbers = #tpu.dot_dimension_numbers<[1], [0], [0], [1], [0, 0, 1, 1], [], []>} : vector<8x128xf32>, vector<128x128xf32>, vector<8x128xf32> -> vector<8x128xf32>
    %c0_9 = arith.constant 0 : index
    %c0_10 = arith.constant 0 : index
    %10 = vector.load %arg5[%c0_9, %c0_10] : memref<1x128xf32, #tpu.memory_space<vmem>>, vector<1x128xf32>
    %11 = vector.broadcast %10 : vector<1x128xf32> to vector<8x128xf32>
    %12 = arith.addf %9, %11 : vector<8x128xf32>
    %cst_11 = arith.constant 0.000000e+00 : f32
    %13 = vector.broadcast %cst_11 : f32 to vector<8x128xf32>
    %14 = arith.maximumf %12, %13 : vector<8x128xf32>
    %15 = arith.truncf %14 : vector<8x128xf32> to vector<8x128xbf16>
    %c0_12 = arith.constant 0 : index
    %c0_13 = arith.constant 0 : index
    %16 = vector.load %arg6[%c0_12, %c0_13] : memref<128x640xbf16, #tpu.memory_space<vmem>>, vector<128x640xbf16>
    %cst_14 = arith.constant dense<0.000000e+00> : vector<8x640xf32>
    %17 = tpu.matmul %15, %16, %cst_14 {dimension_numbers = #tpu.dot_dimension_numbers<[1], [0], [0], [1], [0, 0, 1, 1], [], []>} : vector<8x128xbf16>, vector<128x640xbf16>, vector<8x640xf32> -> vector<8x640xf32>
    %c0_15 = arith.constant 0 : index
    %c0_16 = arith.constant 0 : index
    %18 = vector.load %arg7[%c0_15, %c0_16] : memref<1x640xf32, #tpu.memory_space<vmem>>, vector<1x640xf32>
    %19 = vector.broadcast %18 : vector<1x640xf32> to vector<8x640xf32>
    %20 = arith.addf %17, %19 : vector<8x640xf32>
    %c0_17 = arith.constant 0 : index
    %c0_18 = arith.constant 0 : index
    %21 = vector.load %arg8[%c0_17, %c0_18] : memref<8x640xf32, #tpu.memory_space<vmem>>, vector<8x640xf32>
    tpu.vector_store %arg8[%c0_17, %c0_18], %20 {strides = array<i32>} : memref<8x640xf32, #tpu.memory_space<vmem>>, vector<8x640xf32>,
    return
  }
  func.func @transform_0(%arg0: i32) -> (i32, i32) {
    %c0_i32 = arith.constant 0 : i32
    %c0_i32_0 = arith.constant 0 : i32
    %c0_i32_1 = arith.constant 0 : i32
    return %c0_i32, %c0_i32_0 : i32, i32
  }
  func.func @transform_1(%arg0: i32) -> (i32, i32) {
    %c0_i32 = arith.constant 0 : i32
    %c0_i32_0 = arith.constant 0 : i32
    %c0_i32_1 = arith.constant 0 : i32
    return %c0_i32, %c0_i32_0 : i32, i32
  }
  func.func @transform_2(%arg0: i32) -> (i32, i32) {
    %c0_i32 = arith.constant 0 : i32
    %c0_i32_0 = arith.constant 0 : i32
    %c0_i32_1 = arith.constant 0 : i32
    return %c0_i32, %c0_i32_0 : i32, i32
  }
  func.func @transform_3(%arg0: i32) -> (i32, i32) {
    %c0_i32 = arith.constant 0 : i32
    %c0_i32_0 = arith.constant 0 : i32
    %c0_i32_1 = arith.constant 0 : i32
    return %c0_i32, %c0_i32_0 : i32, i32
  }
  func.func @transform_4(%arg0: i32) -> (i32, i32) {
    %c0_i32 = arith.constant 0 : i32
    %c0_i32_0 = arith.constant 0 : i32
    %c0_i32_1 = arith.constant 0 : i32
    return %c0_i32, %c0_i32_0 : i32, i32
  }
  func.func @transform_5(%arg0: i32) -> (i32, i32) {
    %c0_i32 = arith.constant 0 : i32
    %c0_i32_0 = arith.constant 0 : i32
    return %c0_i32, %arg0 : i32, i32
  }
  func.func @transform_6(%arg0: i32) -> (i32, i32) {
    %c0_i32 = arith.constant 0 : i32
    %c0_i32_0 = arith.constant 0 : i32
    return %c0_i32, %arg0 : i32, i32
  }
  func.func @transform_7(%arg0: i32) -> (i32, i32) {
    %c0_i32 = arith.constant 0 : i32
    %c0_i32_0 = arith.constant 0 : i32
    return %c0_i32, %arg0 : i32, i32
  }
}

</mosaic_0001>

<bundles_post_ra>
// kernel: tpu_custom_call.1
= control target key start
LH: loop header
LB: loop body
LE: loop exit
PB: predicated region body
PF: predicated region fallthrough
CT: control target
= control target key end

     0   :  { %s1950_s0 = inlined_call_operand.hbm [shape: f32[8,8], index: 0, kind: input, shape index: {}]   ;;  %s1951_s1 = inlined_call_operand.hbm [shape: f32[8,128], index: 1, kind: input, shape index: {}]   ;;  %s1952_s2 = inlined_call_operand.vmem [shape: f32[1,128], index: 2, kind: input, shape index: {}]   ;;  %s1953_s3 = inlined_call_operand.hbm [shape: f32[128,128], index: 3, kind: input, shape index: {}]   ;;  %s1954_s4 = inlined_call_operand.vmem [shape: f32[1,128], index: 4, kind: input, shape index: {}]   ;;  %s1955_s5 = inlined_call_operand.hbm [shape: bf16[128,2560], index: 5, kind: input, shape index: {}]   ;;  %s1956_s6 = inlined_call_operand.vmem [shape: f32[1,2560], index: 6, kind: input, shape index: {}]   ;;  %s1957_s7 = inlined_call_operand.hbm [shape: f32[8,2560], index: 7, kind: output, shape index: {}]  }
   0x1   :  { %1965 = sst [smem:[#allocation17_spill]] %s1951_s1 }
   0x2   :  { %12 = vsyncpa [#allocation3], 0 }
   0x3   :  { %13 = vsyncpa [#allocation6], 0 }
   0x4   :  { %14 = vsyncpa [#allocation9], 0 }
   0x5   :  { %16 = vsyncpa [#allocation9 + $0x1], 0 }
   0x6   :  { %17 = vsyncpa [#allocation4], 0 }
   0x7   :  { %19 = vsyncpa [#allocation4 + $0x1], 0  ;;  %s1633_s24 = smov 0   ;;  %s1635_s25 = smov 0  }
   0x8   :  { %s1637_s26 = smov 0   ;;  %s1639_s27 = smov 0  }
   0x9 LB: > { %s1654_s28 = sadd.s32 4294967295, %s1577_s27   ;;  %s1073_s29 = sadd.s32 4294967294, %s1577_s27   ;;  %s1577_s27 = sphi %s1639_s27, %s1986_s27   ;;  %s1573_s26 = sphi %s1637_s26, %s1990_s26   ;;  %s1569_s25 = sphi %s1635_s25, %s1989_s25   ;;  %s1565_s24 = sphi %s1633_s24, %s1988_s24  }
   0xa   : > { %s1658_s30 = sadd.s32 1, %s1577_s27   ;;  %s137_s8 = sadd.s32 1, %s1573_s26 }
   0xb   : > { %1966 = sst [smem:[#allocation15_spill]] %s1658_s30  ;;  %s134_s9 = ssub.s32 %s1577_s27, %s1658_s30 }
   0xc   : > { %p144_p0 = scmp.ne.s32.totalorder %s1573_s26, %s1569_s25  ;;  %p135_p1 = scmp.eq.s32.totalorder %s134_s9, 0 }
   0xd   : > { %p145_p2 = scmp.eq.s32.totalorder %s1577_s27, 0  ;;  %p150_p3 = scmp.ne.s32.totalorder %s1569_s25, %s1565_s24 }
   0xe   : > { %p1958_p4 = scmp.eq.s32.totalorder %s1654_s28, 0  ;;  %p200_p7 = scmp.eq.s32.totalorder %s1654_s28, 3 }
   0xf   : > { %s1670_s10 = scalar_select %p135_p1, %s1573_s26, %s137_s8  }
  0x10   : > { %p1672_p5 = por %p145_p2, %p144_p0  ;;  %p1678_p6 = por %p1958_p4, %p150_p3 }
  0x11   : > { %1967 = sst [smem:[#allocation16_spill]] %s1670_s10  ;;  %p206_p8 = scmp.eq.s32.totalorder %s1073_s29, 3 }
  0x12   : > { %s1969_s12 = scalar_select %p1678_p6, 1, 0 }
  0x13   : > { %p1074_p9 = scmp.ge.s32.totalorder %s1577_s27, 1  ;;  %p213_p10 = scmp.lt.s32.totalorder %s1577_s27, 5 }
  0x14   : > { %p1685_p11 = por %p200_p7, %p144_p0  ;;  %p1689_p12 = por %p206_p8, %p150_p3 }
  0x15   : > { %p1693_p13 = pnand %p1074_p9, %p213_p10  ;;  %s1579_s16 = smov [#allocation5]  }
  0x16   : > { %s1970_s13 = scalar_select %p1685_p11, 1, 0 }
  0x17   : > { %s1971_s14 = scalar_select %p1689_p12, 1, 0 }
  0x18   : > { %s1972_s15 = scalar_select %p1693_p13, 1, 0 }
  0x19   : > { %p1263_p1 = pneg %p1693_p13  ;;  %s237_s17 = sshll.u32 %s1579_s16, 4  ;;  %s238_s17 = int_to_ptr.vmem [resolvable:$true] %s237_s17 }
  0x1a   : > { %p1284_p2 = scmp.lt.s32.totalorder %s1577_s27, 4  ;;  %s1580_s20 = smov [#allocation2]  }
  0x1b   : > { %p1702_p0 = pnand %p1263_p1, %p1958_p4  ;;  %s226_s21 = sshll.u32 %s1580_s20, 4  ;;  %s1712_s21 = int_to_ptr.vmem [resolvable:$true] %s226_s21 }
  0x1c   : > { %p1708_p3 = pnand %p1284_p2, %p1672_p5  ;;  %s1975_s1 = sld [smem:[#allocation17_spill]] }
  0x1d   : > { %p1722_p8 = pneg %p1702_p0 }
  0x1e   : > { %s1974_s19 = scalar_select %p1708_p3, 1, 0 }
  0x22   : > { %s1389_s29 = scalar_lea.hbm %s1975_s1, 128 }
  0x23   : > { %p1390_p7 = scmp.ne.s32.totalorder %s1975_s1, %s1389_s29  ;;  %p1396_p10 = scmp.lt.u32.totalorder %s1389_s29, %s1975_s1 }
  0x25   : > { %p1392_p5 = pnand %p1722_p8, %p1390_p7 }
  0x27   : > { %p1393_p9 = pneg %p1392_p5 }
  0x29   : > { %p1398_p1 = pnand %p1396_p10, %p1393_p9 }
  0x2b   : > { %1401 = shalt.err (!%p1398_p1)
}
  0x2c   : > { %s1402_s22 = scalar_lea.vmem %s238_s17, 128  ;;  %p1410_p11 = scmp.lt.s32.totalorder %s238_s17, %s238_s17 }
  0x2d   : > { %p1403_p2 = scmp.ne.s32.totalorder %s238_s17, %s1402_s22  ;;  %p1411_p6 = scmp.lt.s32.totalorder %s1402_s22, %s1402_s22 }
  0x2f   : > { %p1405_p4 = pnand %p1403_p2, %p1722_p8  ;;  %p1412_p13 = por %p1411_p6, %p1410_p11 }
  0x31   : > { %p1406_p12 = pneg %p1405_p4 }
  0x33   : > { %p1413_p3 = pnand %p1412_p13, %p1406_p12 }
  0x35   : > { %1416 = shalt.err (!%p1413_p3)
}
  0x36   : > { %1269 = dma.hbm_to_vmem [thread:$0]  (!%p1702_p0), %s1975_s1, 128, %s238_s17, [#allocation6]  }
  0x37   : > { %s1417_s16 = scalar_lea.hbm %s1950_s0, 128 }
  0x38   : > { %p1418_p4 = scmp.ne.s32.totalorder %s1950_s0, %s1417_s16  ;;  %p1424_p11 = scmp.lt.u32.totalorder %s1417_s16, %s1950_s0 }
  0x3a   : > { %p1420_p7 = pnand %p1418_p4, %p1722_p8 }
  0x3c   : > { %p1421_p6 = pneg %p1420_p7 }
  0x3e   : > { %p1426_p12 = pnand %p1424_p11, %p1421_p6 }
  0x40   : > { %1429 = shalt.err (!%p1426_p12)
}
  0x41   : > { %s1430_s17 = scalar_lea.vmem %s1712_s21, 128  ;;  %p1438_p9 = scmp.lt.s32.totalorder %s1712_s21, %s1712_s21 }
  0x42   : > { %p1431_p13 = scmp.ne.s32.totalorder %s1712_s21, %s1430_s17  ;;  %p1439_p10 = scmp.lt.s32.totalorder %s1430_s17, %s1430_s17 }
  0x44   : > { %p1433_p3 = pnand %p1431_p13, %p1722_p8  ;;  %p1440_p1 = por %p1439_p10, %p1438_p9 }
  0x46   : > { %p1434_p5 = pneg %p1433_p3 }
  0x48   : > { %p1441_p2 = pnand %p1440_p1, %p1434_p5 }
  0x4a   : > { %1444 = shalt.err (!%p1441_p2)
}
  0x4b   : > { %1266 = dma.hbm_to_vmem [thread:$0]  (!%p1702_p0), %s1950_s0, 128, %s1712_s21, [#allocation3]  }
  0x4c   : > { %s1581_s23 = smov [#allocation7]   ;;  %s1445_s16 = scalar_lea.hbm %s1953_s3, 2048 }
  0x4d   : > { %s250_s8 = sshll.u32 %s1581_s23, 4  ;;  %p1446_p4 = scmp.ne.s32.totalorder %s1953_s3, %s1445_s16  ;;  %s251_s8 = int_to_ptr.vmem [resolvable:$true] %s250_s8 }
  0x4e   : > { %p1452_p11 = scmp.lt.u32.totalorder %s1445_s16, %s1953_s3 }
  0x4f   : > { %p1448_p7 = pnand %p1446_p4, %p1722_p8 }
  0x51   : > { %p1449_p6 = pneg %p1448_p7 }
  0x53   : > { %p1454_p12 = pnand %p1452_p11, %p1449_p6 }
  0x55   : > { %1457 = shalt.err (!%p1454_p12)
}
  0x56   : > { %s1458_s21 = scalar_lea.vmem %s251_s8, 2048  ;;  %p1466_p9 = scmp.lt.s32.totalorder %s251_s8, %s251_s8 }
  0x57   : > { %p1459_p13 = scmp.ne.s32.totalorder %s251_s8, %s1458_s21  ;;  %p1467_p10 = scmp.lt.s32.totalorder %s1458_s21, %s1458_s21 }
  0x59   : > { %p1461_p3 = pnand %p1459_p13, %p1722_p8  ;;  %p1468_p1 = por %p1467_p10, %p1466_p9 }
  0x5b   : > { %p1462_p5 = pneg %p1461_p3 }
  0x5d   : > { %p1469_p2 = pnand %p1468_p1, %p1462_p5 }
  0x5f   : > { %1472 = shalt.err (!%p1469_p2)
}
  0x60   : > { %s1582_s30 = smov 128   ;;  %s1583_s1 = smov 8  }
  0x61   : > { %1272 = dma.hbm_to_vmem [thread:$0]  (!%p1702_p0), %s1953_s3, 2048, %s251_s8, [#allocation6], %s1582_s30, %s1582_s30, %s1583_s1  }
  0x62   : > { %s267_s11 = sand.u32 1, %s1573_s26   ;;  %s1130_s29 = smul.u32 320, %s1577_s27 }
  0x63   : > { %s1244_s9 = smul.u32 320, %s267_s11  ;;  %s1788_s18 = scalar_lea.sflag [#allocation9], %s267_s11 }
  0x64   : > { %s1784_s22 = scalar_lea.hbm %s1955_s5, %s1130_s29  ;;  %p1977_p8 = scmp.ne.s32.totalorder %s1974_s19, 0 }
  0x65   : > { %s271_s17 = scalar_lea.vmem [#allocation8], %s1244_s9  ;;  %s1473_s10 = scalar_lea.hbm %s1784_s22, 5120 }
  0x66   : > { %s278_s21 = sshll.u32 %s271_s17, 4  ;;  %p1474_p0 = scmp.ne.s32.totalorder %s1784_s22, %s1473_s10  ;;  %s1786_s21 = int_to_ptr.vmem [resolvable:$true] %s278_s21 }
  0x67   : > { %p1475_p4 = pneg %p1977_p8  ;;  %s1478_s1 = scalar_lea.hbm %s1955_s5, 20480 }
  0x68   : > { %p1479_p11 = scmp.lt.u32.totalorder %s1784_s22, %s1955_s5  ;;  %p1480_p12 = scmp.lt.u32.totalorder %s1478_s1, %s1473_s10 }
  0x69   : > { %p1476_p7 = pnand %p1475_p4, %p1474_p0  ;;  %p1482_p3 = scmp.lt.u32.totalorder %s1473_s10, %s1784_s22 }
  0x6a   : > { %p1481_p13 = por %p1480_p12, %p1479_p11 }
  0x6b   : > { %p1477_p6 = pneg %p1476_p7 }
  0x6c   : > { %p1483_p5 = por %p1482_p3, %p1481_p13 }
  0x6e   : > { %p1484_p9 = pnand %p1483_p5, %p1477_p6 }
  0x70   : > { %1487 = shalt.err (!%p1484_p9)
}
  0x71   : > { %s1488_s11 = scalar_lea.vmem %s1786_s21, 5120  ;;  %s1584_s9 = smov [#allocation8]  }
  0x72   : > { %p1489_p10 = scmp.ne.s32.totalorder %s1786_s21, %s1488_s11  ;;  %s1493_s16 = sshll.u32 %s1584_s9, 4  ;;  %s1494_s16 = int_to_ptr.vmem [resolvable:$false] %s1493_s16 }
  0x73   : > { %s1495_s20 = scalar_lea.vmem %s1494_s16, 10240  ;;  %p1496_p0 = scmp.lt.s32.totalorder %s1786_s21, %s1494_s16 }
  0x74   : > { %p1491_p1 = pnand %p1489_p10, %p1475_p4  ;;  %p1497_p7 = scmp.lt.s32.totalorder %s1495_s20, %s1488_s11 }
  0x76   : > { %p1492_p2 = pneg %p1491_p1  ;;  %p1498_p11 = por %p1497_p7, %p1496_p0 }
  0x78   : > { %p1499_p12 = pnand %p1498_p11, %p1492_p2 }
  0x7a   : > { %1502 = shalt.err (!%p1499_p12)
}
  0x7b   : > { %s1585_s17 = smov 1280   ;;  %s1586_s10 = smov 320  }
  0x7c   : > { %s1587_s8 = smov 20   ;;  %p1978_p4 = scmp.ne.s32.totalorder %s1972_s15, 0 }
  0x7d   : > { %1276 = dma.hbm_to_vmem [thread:$0]  (!%p1977_p8), %s1784_s22, 5120, %s1786_s21, %s1788_s18, %s1585_s17, %s1586_s10, %s1587_s8  }
  0x7e   : > { %298 = sbr.rel (%p1978_p4) target bundleno = 840 (0x348), region = 48  ;;  %p1979_p6 = scmp.eq.s32.totalorder (!%p1978_p4), %s1654_s28, 0 }
  0x85   : > { %1548 = dma.done.wait (%p1979_p6), [#allocation3], 128   ;;  %p1980_p13 = pmov %p1979_p6 }
  0x86   : > { %p1981_p3 = pmov %p1979_p6 }
  0x87   : > { %1550 = vsyncadd (%p1980_p13), [#allocation3], 4294967168 }
  0x88   : > { %1552 = dma.done.wait (%p1981_p3), [#allocation6], 2176   ;;  %p1982_p5 = pmov %p1981_p3 }
  0x89   : > { %s1827_s30 = sand.u32 1, %s1569_s25   ;;  %p1983_p8 = scmp.ne.s32.totalorder %s1969_s12, 0 }
  0x8a   : > { %1554 = vsyncadd (%p1982_p5), [#allocation6], 4294965120  ;;  %s1245_s15 = smul.u32 320, %s1827_s30  ;;  %s313_s19 = scalar_lea.sflag [#allocation9], %s1827_s30 }
  0x8c   : > { %s1831_s22 = scalar_lea.vmem [#allocation8], %s1245_s15 }
  0x8d   : > { %1556 = dma.done.wait (%p1983_p8), %s313_s19, 5120  }
  0x8e   : > { %1558 = vsyncadd (%p1983_p8), %s313_s19, 4294962176  ;;  %v1588_v0 = vmov 0.0   ;;  %vm1589_vm0 = vmmov 0   ;;  %v1590_v1 = vmov 0.0|0.0   ;;  %vm368_vm1 = vcmask 64512   ;;  %v360_v2 = vld [vmem:[#allocation5] sm:$0xff] }
  0x8f   : > { %1160 = vmatprep.subr.mxu0 %v1588_v0  ;;  %1162 = vmatprep.mubr.msk.f32.mxu0 %vm1589_vm0, %v1588_v0  ;;  %v359_v3 = vld [vmem:[#allocation2] sm:$0xff]  ;;  %v443_v4 = vld [vmem:[#allocation7] sm:$0xff]  ;;  %v444_v5 = vld [vmem:[#allocation7 + $0x8] sm:$0xff]  ;;  %s352_s23 = smul.u32 5, %s1654_s28  ;;  %p1984_p1 = scmp.ne.s32.totalorder %s1970_s13, 0 }
  0x90   : > { %1220 = vmatprep.subr.bf16.mxu1 %v1590_v1  ;;  %1197 = vmatprep.mubr.msk.f32.mxu1 %vm1589_vm0, %v1588_v0  ;;  %v445_v6 = vld [vmem:[#allocation7 + $0x10] sm:$0xff]  ;;  %v446_v7 = vld [vmem:[#allocation7 + $0x18] sm:$0xff]  ;;  %v1221_v8 = vpack.c.bf16 %v444_v5, %v443_v4  ;;  %v447_v10 = vld [vmem:[#allocation7 + $0x20] sm:$0xff]  ;;  %s1246_s16 = smul.u32 40, %s1827_s30 }
  0x91   : > { %1161 = vmatpush3.msra.mxu0 %v360_v2  ;;  %v1224_v9 = vpack.c.bf16 %v446_v7, %v445_v6  ;;  %v448_v11 = vld [vmem:[#allocation7 + $0x28] sm:$0xff]  ;;  %v449_v12 = vld [vmem:[#allocation7 + $0x30] sm:$0xff]  ;;  %v450_v13 = vld [vmem:[#allocation7 + $0x38] sm:$0xff]  ;;  %v1591_v2 = vmov 0   ;;  %p353_p9 = scmp.lt.s32.totalorder %s352_s23, 19  ;;  %s1131_s17 = smul.u32 640, %s1654_s28 }
  0x92   : > { %1163 = vmatmul.mubr.msk.f32.vlgmr.msra.gmra.mrb[0].mxu0 %vm368_vm1, %v359_v3  ;;  %1222 = vmatpush3.bf16.msra.mxu1 %v1221_v8  ;;  %v1227_v14 = vpack.c.bf16 %v448_v11, %v447_v10  ;;  %v451_v15 = vld [vmem:[#allocation7 + $0x40] sm:$0xff]  ;;  %v452_v16 = vld [vmem:[#allocation7 + $0x48] sm:$0xff]  ;;  %v1230_v17 = vpack.c.bf16 %v450_v13, %v449_v12  ;;  %v453_v18 = vld [vmem:[#allocation7 + $0x50] sm:$0xff]  ;;  %s350_s20 = scalar_lea.vmem [#allocation10], %s1246_s16  ;;  %s1592_s28 = smov [#allocation10]  }
  0x93   : > { %1223 = vmatprep.subr.bf16.mxu1 %v1590_v1  ;;  %v454_v19 = vld [vmem:[#allocation7 + $0x58] sm:$0xff]  ;;  %v1233_v20 = vpack.c.bf16 %v452_v16, %v451_v15  ;;  %v455_v21 = vld [vmem:[#allocation7 + $0x60] sm:$0xff]  ;;  %v456_v23 = vld [vmem:[#allocation7 + $0x68] sm:$0xff]  ;;  %853 = vmatprep.mubr.bf16.mxu0 %v1591_v2  ;;  %s1992_s23 = smov (!%p353_p9, %s352_s23), 19  ;;  %s963_s10 = sshll.u32 %s350_s20, 4  ;;  %s1909_s10 = int_to_ptr.vmem [resolvable:$true] %s963_s10 }
  0x94   : > { %v1236_v22 = vpack.c.bf16 %v454_v19, %v453_v18  ;;  %v1239_v24 = vpack.c.bf16 %v456_v23, %v455_v21  ;;  %v457_v25 = vld [vmem:[#allocation7 + $0x70] sm:$0xff]  ;;  %v458_v26 = vld [vmem:[#allocation7 + $0x78] sm:$0xff]  ;;  %v1338_v30 = vld [vmem:[%s1831_s22 + $0xc] ss:$20 sps:$4 sm:$0xff]   ;;  %s355_s9 = scalar_lea.vmem %s1956_s6, %s1992_s23  ;;  %s1907_s19 = scalar_lea.hbm %s1957_s7, %s1131_s17 }
  0x95   : > { %v1242_v27 = vpack.c.bf16 %v458_v26, %v457_v25  ;;  %v1333_v28 = vld [vmem:[%s1831_s22] ss:$20 sps:$4 sm:$0xff]   ;;  %v1335_v29 = vld [vmem:[%s1831_s22 + $0x4] ss:$20 sps:$4 sm:$0xff]   ;;  %v1339_v32 = vld [vmem:[%s1831_s22 + $0x28] ss:$20 sps:$4 sm:$0xff]  }
  0x96   : > { %1225 = vmatpush3.bf16.msra.mxu1 %v1224_v9  ;;  %v1341_v31 = vld [vmem:[%s1831_s22 + $0x2c] ss:$20 sps:$4 sm:$0xff]   ;;  %821 = vmatprep.subr.bf16.mxu0 %v1335_v29  ;;  %v1347_v33 = vld [vmem:[%s1831_s22 + $0x54] ss:$20 sps:$4 sm:$0xff]   ;;  %v1345_v34 = vld [vmem:[%s1831_s22 + $0x50] ss:$20 sps:$4 sm:$0xff]  }
  0x97   : > { %1226 = vmatprep.subr.bf16.mxu1 %v1590_v1  ;;  %822 = vmatpush1.bf16.msra.mxu0 %v1333_v28  ;;  %v1353_v35 = vld [vmem:[%s1831_s22 + $0x7c] ss:$20 sps:$4 sm:$0xff]   ;;  %v1351_v36 = vld [vmem:[%s1831_s22 + $0x78] ss:$20 sps:$4 sm:$0xff]   ;;  %v1357_v38 = vld [vmem:[%s1831_s22 + $0xa0] ss:$20 sps:$4 sm:$0xff]  }
  0x98   : > { %823 = vmatprep.subr.bf16.mxu0 %v1341_v31  ;;  %v1359_v37 = vld [vmem:[%s1831_s22 + $0xa4] ss:$20 sps:$4 sm:$0xff]   ;;  %v1365_v39 = vld [vmem:[%s1831_s22 + $0xcc] ss:$20 sps:$4 sm:$0xff]   ;;  %v1363_v40 = vld [vmem:[%s1831_s22 + $0xc8] ss:$20 sps:$4 sm:$0xff]  }
  0x99   : > { %v1371_v41 = vld [vmem:[%s1831_s22 + $0xf4] ss:$20 sps:$4 sm:$0xff]   ;;  %v1369_v42 = vld [vmem:[%s1831_s22 + $0xf0] ss:$20 sps:$4 sm:$0xff]   ;;  %v1084_v43 = vld [vmem:[%s1952_s2] ss:$0 sm:$0xff] }
  0x9a   : > { %1228 = vmatpush3.bf16.msra.mxu1 %v1227_v14  ;;  %v1336_v47 = vld [vmem:[%s1831_s22 + $0x8] ss:$20 sps:$4 sm:$0xff]   ;;  %v1342_v50 = vld [vmem:[%s1831_s22 + $0x30] ss:$20 sps:$4 sm:$0xff]   ;;  %v1348_v52 = vld [vmem:[%s1831_s22 + $0x58] ss:$20 sps:$4 sm:$0xff]  }
  0x9b   : > { %1229 = vmatprep.subr.bf16.mxu1 %v1590_v1  ;;  %824 = vmatpush1.bf16.msra.mxu0 %v1339_v32  ;;  %v1344_v49 = vld [vmem:[%s1831_s22 + $0x34] ss:$20 sps:$4 sm:$0xff]   ;;  %v1350_v51 = vld [vmem:[%s1831_s22 + $0x5c] ss:$20 sps:$4 sm:$0xff]   ;;  %v1356_v53 = vld [vmem:[%s1831_s22 + $0x84] ss:$20 sps:$4 sm:$0xff]  }
  0x9c   : > { %825 = vmatprep.subr.bf16.mxu0 %v1347_v33  ;;  %v1354_v54 = vld [vmem:[%s1831_s22 + $0x80] ss:$20 sps:$4 sm:$0xff]   ;;  %v1360_v56 = vld [vmem:[%s1831_s22 + $0xa8] ss:$20 sps:$4 sm:$0xff]   ;;  %v1366_v58 = vld [vmem:[%s1831_s22 + $0xd0] ss:$20 sps:$4 sm:$0xff]  }
  0x9d   : > { %v1362_v55 = vld [vmem:[%s1831_s22 + $0xac] ss:$20 sps:$4 sm:$0xff]   ;;  %v1368_v57 = vld [vmem:[%s1831_s22 + $0xd4] ss:$20 sps:$4 sm:$0xff]   ;;  %v1374_v59 = vld [vmem:[%s1831_s22 + $0xfc] ss:$20 sps:$4 sm:$0xff]  }
  0x9e   : > { %1231 = vmatpush3.bf16.msra.mxu1 %v1230_v17  ;;  %v1372_v60 = vld [vmem:[%s1831_s22 + $0xf8] ss:$20 sps:$4 sm:$0xff]   ;;  %v1377_v61 = vld [vmem:[%s1831_s22 + $0x11c] ss:$20 sps:$4 sm:$0xff]   ;;  %v1383_v11 = vld [vmem:[%s1831_s22 + $0x60] ss:$20 sps:$4 sm:$0xff]   ;;  %v588_v17 = vlaneseq }
  0x9f   : > { %1232 = vmatprep.subr.bf16.mxu1 %v1590_v1  ;;  %826 = vmatpush1.bf16.msra.mxu0 %v1345_v34  ;;  %v1375_v62 = vld [vmem:[%s1831_s22 + $0x118] ss:$20 sps:$4 sm:$0xff]   ;;  %v1381_v8 = vld [vmem:[%s1831_s22 + $0x10] ss:$20 sps:$4 sm:$0xff]   ;;  %v1384_v12 = vld [vmem:[%s1831_s22 + $0x88] ss:$20 sps:$4 sm:$0xff]  }
  0xa0   : > { %827 = vmatprep.subr.bf16.mxu0 %v1353_v35  ;;  %v1380_v63 = vld [vmem:[%s1831_s22 + $0x124] ss:$20 sps:$4 sm:$0xff]   ;;  %v1387_v15 = vld [vmem:[%s1831_s22 + $0x100] ss:$20 sps:$4 sm:$0xff]   ;;  %v1388_v16 = vld [vmem:[%s1831_s22 + $0x128] ss:$20 sps:$4 sm:$0xff]  }
  0xa1   : > { %v1086_v3 = vld [vmem:[%s1954_s4] ss:$0 sm:$0xff]  ;;  %v1385_v13 = vld [vmem:[%s1831_s22 + $0xb0] ss:$20 sps:$4 sm:$0xff]   ;;  %v589_v18 = vshrl.u32 %v588_v17, 7  ;;  %s1503_s12 = scalar_lea.vmem %s1909_s10, 640 }
  0xa2   : > { %1234 = vmatpush3.bf16.msra.mxu1 %v1233_v20  ;;  %v1382_v10 = vld [vmem:[%s1831_s22 + $0x38] ss:$20 sps:$4 sm:$0xff]   ;;  %p1504_p10 = scmp.ne.s32.totalorder %s1909_s10, %s1503_s12  ;;  %s1507_s21 = sshll.u32 %s1592_s28, 4  ;;  %s1508_s21 = int_to_ptr.vmem [resolvable:$false] %s1507_s21 }
  0xa3   : > { %1235 = vmatprep.subr.bf16.mxu1 %v1590_v1  ;;  %828 = vmatpush1.bf16.msra.mxu0 %v1351_v36  ;;  %v1386_v14 = vld [vmem:[%s1831_s22 + $0xd8] ss:$20 sps:$4 sm:$0xff]   ;;  %v590_v19 = vsub.s32 0, %v589_v18  ;;  %v598_v20 = vsub.s32 2, %v589_v18  ;;  %v602_v23 = vsub.s32 3, %v589_v18  ;;  %s1509_s18 = scalar_lea.vmem %s1508_s21, 1280  ;;  %p1510_p7 = scmp.lt.s32.totalorder %s1909_s10, %s1508_s21 }
  0xa4   : > { %829 = vmatprep.subr.bf16.mxu0 %v1359_v37  ;;  %v586_v21 = vld [vmem:[%s355_s9] sm:$0x1f]  ;;  %p1505_p2 = pnand %p1504_p10, %p1984_p1  ;;  %p1511_p11 = scmp.lt.s32.totalorder %s1509_s18, %s1503_s12 }
  0xa5   : > { %v599_v25 = vrot.slane %v586_v21, %v598_v20  ;;  %v603_v26 = vrot.slane %v586_v21, %v602_v23 }
  0xa6   : > { %1237 = vmatpush3.bf16.msra.mxu1 %v1236_v22  ;;  %v594_v22 = vsub.s32 1, %v589_v18  ;;  %p1506_p0 = pneg %p1505_p2  ;;  %p1512_p12 = por %p1511_p11, %p1510_p7 }
  0xa7   : > { %1238 = vmatprep.subr.bf16.mxu1 %v1590_v1  ;;  %830 = vmatpush1.bf16.msra.mxu0 %v1357_v38 }
  0xa8   : > { %831 = vmatprep.subr.bf16.mxu0 %v1365_v39  ;;  %v606_v39 = vsub.s32 4, %v589_v18  ;;  %p1513_p4 = pnand %p1512_p12, %p1506_p0 }
  0xaa   : > { %1240 = vmatpush3.bf16.msra.mxu1 %v1239_v24  ;;  %v591_v24 = vrot.slane %v586_v21, %v590_v19 }
  0xab   : > { %1241 = vmatprep.subr.bf16.mxu1 %v1590_v1  ;;  %832 = vmatpush1.bf16.msra.mxu0 %v1363_v40  ;;  %v1378_v1 = vld [vmem:[%s1831_s22 + $0x120] ss:$20 sps:$4 sm:$0xff]   ;;  %v607_v40 = vrot.slane %v586_v21, %v606_v39  ;;  %s949_s22 = scalar_lea.sflag [#allocation4], %s1827_s30 }
  0xac   : > { %833 = vmatprep.subr.bf16.mxu0 %v1371_v41 }
  0xae   : > { %1243 = vmatpush3.bf16.msra.mxu1 %v1242_v27 }
  0xaf   : > { %862 = vmatprep.subr.bf16.mxu1 %v1338_v30  ;;  %834 = vmatpush1.bf16.msra.mxu0 %v1369_v42 }
  0xb0   : > { %835 = vmatprep.subr.bf16.mxu0 %v1377_v61 }
  0xb3   : > { %836 = vmatpush1.bf16.msra.mxu0 %v1375_v62 }
  0xb4   : > { %1200 = vmatprep.subr.bf16.mxu0 %v1588_v0 }
 0x165   : > { %v438_v44 = vpop.f32.mrb[0].mxu0 }
 0x166   : > { %v439_v45 = vadd.f32 %v1084_v43, %v438_v44  ;;  %v1164_v46 = vpop.f32.mrb[1].mxu0 }
 0x168   : > { %v442_v48 = vmax.f32 %v439_v45, 0.0 }
 0x16a   : > { %1198 = vmatmul.mubr.f32.vlgmr.msra.gmra.mrb[0].mxu1 %v442_v48 }
 0x16b   : > { %863 = vmatpush1.bf16.msra.mxu1 %v1336_v47  ;;  %894 = vmatprep.mubr.bf16.mxu1 %v1591_v2 }
 0x16c   : > { %864 = vmatprep.subr.bf16.mxu1 %v1344_v49 }
 0x16f   : > { %865 = vmatpush1.bf16.msra.mxu1 %v1342_v50 }
 0x170   : > { %866 = vmatprep.subr.bf16.mxu1 %v1350_v51 }
 0x173   : > { %867 = vmatpush1.bf16.msra.mxu1 %v1348_v52 }
 0x174   : > { %868 = vmatprep.subr.bf16.mxu1 %v1356_v53 }
 0x177   : > { %869 = vmatpush1.bf16.msra.mxu1 %v1354_v54 }
 0x178   : > { %870 = vmatprep.subr.bf16.mxu1 %v1362_v55 }
 0x17b   : > { %871 = vmatpush1.bf16.msra.mxu1 %v1360_v56 }
 0x17c   : > { %872 = vmatprep.subr.bf16.mxu1 %v1368_v57 }
 0x17f   : > { %873 = vmatpush1.bf16.msra.mxu1 %v1366_v58 }
 0x180   : > { %874 = vmatprep.subr.bf16.mxu1 %v1374_v59 }
 0x183   : > { %875 = vmatpush1.bf16.msra.mxu1 %v1372_v60 }
 0x184   : > { %876 = vmatprep.subr.bf16.mxu1 %v1380_v63 }
 0x187   : > { %877 = vmatpush1.bf16.msra.mxu1 %v1378_v1 }
 0x23d   : > { %v532_v4 = vpop.f32.mrb[0].mxu1 }
 0x23e   : > { %v533_v5 = vadd.f32 %v1086_v3, %v532_v4  ;;  %v1199_v6 = vpop.f32.mrb[1].mxu1 }
 0x240   : > { %v536_v7 = vmax.f32 %v533_v5, 0.0 }
 0x242   : > { %v537_v9 = vpack.c.bf16 %v536_v7, %v536_v7 }
 0x244   : > { %854 = vmatmul.mubr.bf16.vlgmr.msra.gmra.mrb[4].mxu0 %v537_v9  ;;  %895 = vmatmul.mubr.bf16.vlgmr.msra.gmra.mrb[4].mxu1 %v537_v9 }
 0x245   : > { %1201 = vmatpush3.bf16.msra.mxu0 %v1381_v8  ;;  %1216 = vmatprep.mubr.msk.bf16.mxu0 %vm1589_vm0, %v1588_v0 }
 0x246   : > { %1202 = vmatprep.subr.bf16.mxu0 %v1588_v0 }
 0x249   : > { %1203 = vmatpush3.bf16.msra.mxu0 %v1382_v10 }
 0x24a   : > { %1204 = vmatprep.subr.bf16.mxu0 %v1588_v0 }
 0x24d   : > { %1205 = vmatpush3.bf16.msra.mxu0 %v1383_v11 }
 0x24e   : > { %1206 = vmatprep.subr.bf16.mxu0 %v1588_v0 }
 0x251   : > { %1207 = vmatpush3.bf16.msra.mxu0 %v1384_v12 }
 0x252   : > { %1208 = vmatprep.subr.bf16.mxu0 %v1588_v0 }
 0x255   : > { %1209 = vmatpush3.bf16.msra.mxu0 %v1385_v13 }
 0x256   : > { %1210 = vmatprep.subr.bf16.mxu0 %v1588_v0 }
 0x259   : > { %1211 = vmatpush3.bf16.msra.mxu0 %v1386_v14 }
 0x25a   : > { %1212 = vmatprep.subr.bf16.mxu0 %v1588_v0 }
 0x25d   : > { %1213 = vmatpush3.bf16.msra.mxu0 %v1387_v15 }
 0x25e   : > { %1214 = vmatprep.subr.bf16.mxu0 %v1588_v0  ;;  %v595_v0 = vrot.slane %v586_v21, %v594_v22 }
 0x261   : > { %1215 = vmatpush3.bf16.msra.mxu0 %v1388_v16 }
 0x264   : > { %1217 = vmatmul.mubr.bf16.vlgmr.msra.gmra.mrb[8].mxu0 %v537_v9 }
 0x317   : > { %v855_v27 = vpop.f32.mrb[4].mxu0  ;;  %v896_v28 = vpop.f32.mrb[4].mxu1 }
 0x318   : > { %v856_v29 = vadd.f32 %v855_v27, %v591_v24  ;;  %v897_v30 = vadd.f32 %v896_v28, %v599_v25  ;;  %v857_v31 = vpop.f32.mrb[5].mxu0  ;;  %v898_v32 = vpop.f32.mrb[5].mxu1 }
 0x319   : > { %v858_v33 = vadd.f32 %v857_v31, %v595_v0  ;;  %v899_v34 = vadd.f32 %v898_v32, %v603_v26  ;;  %v859_v35 = vpop.f32.mrb[6].mxu0  ;;  %v900_v36 = vpop.f32.mrb[6].mxu1 }
 0x31a   : > { %943 = vst [vmem:[%s350_s20] sm:$0xff] %v856_v29  ;;  %945 = vst [vmem:[%s350_s20 + $0x10] sm:$0xff] %v897_v30  ;;  %v860_v37 = vpop.f32.mrb[7].mxu0  ;;  %v901_v38 = vpop.f32.mrb[7].mxu1 }
 0x31b   : > { %944 = vst [vmem:[%s350_s20 + $0x8] sm:$0xff] %v858_v33  ;;  %946 = vst [vmem:[%s350_s20 + $0x18] sm:$0xff] %v899_v34 }
 0x337   : > { %v937_v41 = vpop.f32.mrb[8].mxu0 }
 0x338   : > { %v938_v42 = vadd.f32 %v937_v41, %v607_v40  ;;  %v1218_v43 = vpop.f32.mrb[9].mxu0 }
 0x339   : > { %v940_v44 = vpop.f32.mrb[10].mxu0 }
 0x33a   : > { %947 = vst [vmem:[%s350_s20 + $0x20] sm:$0xff] %v938_v42  ;;  %v1219_v45 = vpop.f32.mrb[11].mxu0 }
 0x33b   : > { %1516 = shalt.err (!%p1513_p4)
}
 0x33c   : > { %s1517_s30 = scalar_lea.hbm %s1907_s19, 640  ;;  %s1521_s29 = scalar_lea.hbm %s1957_s7, 2560 }
 0x33d   : > { %p1518_p6 = scmp.ne.s32.totalorder %s1907_s19, %s1517_s30  ;;  %p1522_p5 = scmp.lt.u32.totalorder %s1907_s19, %s1957_s7 }
 0x33e   : > { %p1523_p8 = scmp.lt.u32.totalorder %s1521_s29, %s1517_s30  ;;  %p1525_p10 = scmp.lt.u32.totalorder %s1517_s30, %s1907_s19 }
 0x33f   : > { %p1519_p13 = pnand %p1518_p6, %p1984_p1 }
 0x340   : > { %p1524_p9 = por %p1523_p8, %p1522_p5 }
 0x341   : > { %p1520_p3 = pneg %p1519_p13 }
 0x342   : > { %p1526_p2 = por %p1525_p10, %p1524_p9 }
 0x344   : > { %p1527_p0 = pnand %p1526_p2, %p1520_p3 }
 0x346   : > { %1530 = shalt.err (!%p1527_p0)
}
 0x347   : > { %1261 = dma.vmem_to_hbm [thread:$0]  (%p1984_p1), %s1909_s10, 640, %s1907_s19, %s949_s22  }
 0x348 PF: > { %p1288_p7 = scmp.ge.s32.totalorder %s1577_s27, 2  ;;  %s975_s16 = sand.u32 1, %s1565_s24  }
 0x349   : > { %p1985_p11 = scmp.ne.s32.totalorder %s1971_s14, 0  ;;  %s976_s20 = scalar_lea.sflag [#allocation4], %s975_s16 }
 0x34b   : > { %p1278_p12 = pnand %p1288_p7, %p1985_p11 }
 0x34d   : > { %1560 = dma.done.wait (!%p1278_p12), %s976_s20, 640  }
 0x34e   : > { %1562 = vsyncadd (!%p1278_p12), %s976_s20, 4294966656  ;;  %s1986_s27 = sld [smem:[#allocation15_spill]]  ;;  %s1987_s17 = sld [smem:[#allocation16_spill]] }
 0x34f   : > { %s1988_s24 = smov %s1569_s25  ;;  %s1989_s25 = smov %s1573_s26 }
 0x354   : > { %p22_p4 = scmp.ge.s32.totalorder %s1986_s27, 6   ;;  %s1990_s26 = smov %s1987_s17 }
 0x356   :  { %24 = sbr.rel (!%p22_p4) target bundleno = 9 (0x9), region = 109 }
 0x35d   :  { %981 = vsyncpa [#allocation3], 1 }
 0x35e   :  { %983 = vsyncpa [#allocation3 + $0x1], 1 }
 0x35f   :  { %984 = vsyncpa [#allocation6], 1 }
 0x360   :  { %985 = vsyncpa [#allocation9], 1 }
 0x361   :  { %987 = vsyncpa [#allocation9 + $0x1], 1 }
 0x362   :  { %988 = vsyncpa [#allocation4], 1 }
 0x363   :  { %990 = vsyncpa [#allocation4 + $0x1], 1 }

</bundles_post_ra>
